<compile_context>
chip_gen: v5e
topology: v5e:2x2
jax: 0.10.0
libtpu: 0.0.40
codegen_flags: <defaults>
</compile_context>

<pallas_src>
import functools

import numpy as np
import jax
import jax.numpy as jnp
from jax.experimental import pallas as pl
from jax.experimental.pallas import tpu as pltpu

EPSILON = 1e-6
LOG_2PI = float(np.log(2.0 * np.pi))
LOG_STD_MIN = -20.0
LOG_STD_MAX = 2.0


def _round_up(x, m):
    return (x + m - 1) // m * m


def _choose_tb(batch, block_b, rnd):
    """Pick a batch tile: multiple of `rnd`, <= ~block_b, preferring an exact
    divisor of `batch` (avoids the jnp.pad copy) as long as it is not much
    smaller than the requested tile."""
    cap = max(rnd, _round_up(min(block_b, batch), rnd))
    if batch % rnd == 0:
        tb = cap
        while tb >= max(rnd, cap // 2):
            if batch % tb == 0:
                return tb
            tb -= rnd
    return cap


def policy_kernel(state_ref, noise_ref,
                  w1_ref, b1_ref, w2_ref, b2_ref, wh_ref, bh_ref,
                  out_ref, *, act_dim):
    A = act_dim
    # Hoist the bias reads (each broadcast materialized exactly once).
    b1 = b1_ref[...].astype(jnp.float32)
    b2 = b2_ref[...].astype(jnp.float32)
    bh = bh_ref[...].astype(jnp.float32)
    mm_dtype = w1_ref.dtype  # f32, or bf16 (any generation) when requested

    # Hidden MLP: Linear -> ReLU (x2).  MXU matmuls with f32 accumulation.
    # State arrives f32 and is cast in VMEM (free VPU pack, no wrapper pass).
    h = state_ref[...].astype(mm_dtype)
    h = jnp.maximum(
        jnp.dot(h, w1_ref[...], preferred_element_type=jnp.float32) + b1, 0.0)
    h = jnp.maximum(
        jnp.dot(h.astype(mm_dtype), w2_ref[...],
                preferred_element_type=jnp.float32) + b2, 0.0)

    # Fused mean / log_std heads: one [TB,H2] @ [H2,2A] MXU push.
    heads = jnp.dot(h.astype(mm_dtype), wh_ref[...],
                    preferred_element_type=jnp.float32) + bh
    mean = heads[:, :A]
    log_std = jnp.clip(heads[:, A:], LOG_STD_MIN, LOG_STD_MAX)
    std = jnp.exp(log_std)

    # Reparameterized sample z = mean + std * eps, eps ~ N(0, 1), then squash.
    eps = noise_ref[...].astype(jnp.float32)
    z = mean + std * eps

    # Reuse e2 = exp(-2|z|) for both tanh(z) and sech^2(z):
    #   tanh(z)  = sign(z) * (1 - e2) / (1 + e2)
    #   sech^2(z) = 4*e2 / (1 + e2)^2  ( = 1 - tanh(z)^2 exactly )
    e2 = jnp.exp(-2.0 * jnp.abs(z))
    inv = 1.0 / (1.0 + e2)
    t = (1.0 - e2) * inv
    action = jnp.where(z >= 0.0, t, -t)
    sech2 = 4.0 * e2 * inv * inv

    # Normal(mean, std).log_prob(z) = -0.5*eps^2 - log_std - 0.5*log(2*pi),
    # then subtract log(1 - tanh(z)^2 + eps) with the stable sech^2 form.
    log_prob = -0.5 * eps * eps - log_std - 0.5 * LOG_2PI
    log_prob = log_prob - jnp.log(sech2 + EPSILON)
    lp_sum = jnp.sum(log_prob, axis=1, keepdims=True)

    # Single lane-dense output slab: [action | mean | log_std | log_prob(bcast)].
    out_ref[...] = jnp.concatenate(
        [action, mean, log_std, jnp.broadcast_to(lp_sum, action.shape)], axis=1)


def prepare_params(params, matmul_dtype=jnp.float32):
    """One-time parameter prep (hoisted out of the per-call hot path):
    fuse the mean/log_std heads and cast weights to the matmul dtype."""
    mm = matmul_dtype
    return {
        "w1": params["w1"].astype(mm),
        "b1": params["b1"].astype(jnp.float32),
        "w2": params["w2"].astype(mm),
        "b2": params["b2"].astype(jnp.float32),
        "wh": jnp.concatenate([params["wm"], params["ws"]], axis=1).astype(mm),
        "bh": jnp.concatenate([params["bm"], params["bs"]],
                              axis=1).astype(jnp.float32),
    }


def policy_forward(state, noise, prep, *, block_b=2048, min_grid_steps=2):
    """Stochastic forward pass of PolicyNetwork (deterministic=False).

    `prep` comes from prepare_params().  Returns (action, mean, log_std,
    log_prob) matching the PyTorch module; for deterministic=True the action
    is tanh(mean) of the returned mean.
    """
    B, in_dim = state.shape
    h1 = prep["w1"].shape[1]
    h2 = prep["w2"].shape[1]
    A = prep["bh"].shape[-1] // 2

    # Sublane rounding: bf16 vregs pack (16,128); f32 pack (8,128).
    rnd = 16 if jnp.dtype(prep["w1"].dtype).itemsize == 2 else 8

    # Keep >= min_grid_steps grid steps when the batch allows it, so v7x can
    # shard batch tiles across its two TensorCores (harmless on v5e/v6e).
    cap = block_b
    if B >= min_grid_steps * rnd:
        cap = min(cap, -(-B // min_grid_steps))
    TB = _choose_tb(B, cap, rnd)
    Bp = _round_up(B, TB)
    if Bp != B:
        pad = Bp - B
        state = jnp.pad(state, ((0, pad), (0, 0)))
        noise = jnp.pad(noise, ((0, pad), (0, 0)))

    out_w = 4 * A
    grid = (Bp // TB,)

    def batch_spec(lanes):
        return pl.BlockSpec((TB, lanes), lambda i: (i, 0))

    def full_spec(shape):
        # Weights/biases stay VMEM-resident across the whole batch grid.
        return pl.BlockSpec(shape, lambda i: (0, 0))

    slab = pl.pallas_call(
        functools.partial(policy_kernel, act_dim=A),
        out_shape=jax.ShapeDtypeStruct((Bp, out_w), jnp.float32),
        grid=grid,
        in_specs=[
            batch_spec(in_dim),       # state  (tiled over batch, f32)
            batch_spec(A),            # noise  (tiled over batch, f32)
            full_spec((in_dim, h1)),  # w1
            full_spec((1, h1)),       # b1
            full_spec((h1, h2)),      # w2
            full_spec((1, h2)),       # b2
            full_spec((h2, 2 * A)),   # fused head weight [wm | ws]
            full_spec((1, 2 * A)),    # fused head bias   [bm | bs]
        ],
        out_specs=batch_spec(out_w),
        compiler_params=pltpu.CompilerParams(
            dimension_semantics=("parallel",),  # v7x: batch tiles over 2 TCs
        ),
    )(state, noise, prep["w1"], prep["b1"], prep["w2"], prep["b2"],
      prep["wh"], prep["bh"])

    slab = slab[:B]
    action = slab[:, 0:A]
    mean = slab[:, A:2 * A]
    log_std = slab[:, 2 * A:3 * A]
    log_prob = slab[:, 3 * A:3 * A + 1]
    return action, mean, log_std, log_prob


def xavier_uniform(key, fan_in, fan_out):
    bound = float(np.sqrt(6.0 / (fan_in + fan_out)))
    # stored as [in, out] so the kernel computes h @ W + b directly
    return jax.random.uniform(key, (fan_in, fan_out), jnp.float32, -bound, bound)


def init_params(key, input_size, hidden_sizes, output_size):
    assert len(hidden_sizes) == 2, "kernel is written for 2 hidden layers"
    h1, h2 = hidden_sizes
    k1, k2, k3, k4 = jax.random.split(key, 4)
    return {
        "w1": xavier_uniform(k1, input_size, h1),
        "b1": jnp.full((1, h1), 0.1, jnp.float32),
        "w2": xavier_uniform(k2, h1, h2),
        "b2": jnp.full((1, h2), 0.1, jnp.float32),
        "wm": xavier_uniform(k3, h2, output_size),
        "bm": jnp.full((1, output_size), 0.1, jnp.float32),
        "ws": xavier_uniform(k4, h2, output_size),
        "bs": jnp.full((1, output_size), 0.1, jnp.float32),
    }


def reference_forward(state, noise, p):
    """Pure-JAX reference mirroring PolicyNetwork.forward(deterministic=False)."""
    hp = jax.lax.Precision.HIGHEST
    h = jnp.maximum(jnp.dot(state, p["w1"], precision=hp) + p["b1"], 0.0)
    h = jnp.maximum(jnp.dot(h, p["w2"], precision=hp) + p["b2"], 0.0)
    mean = jnp.dot(h, p["wm"], precision=hp) + p["bm"]
    log_std = jnp.clip(jnp.dot(h, p["ws"], precision=hp) + p["bs"],
                       LOG_STD_MIN, LOG_STD_MAX)
    std = jnp.exp(log_std)
    z = mean + std * noise
    action = jnp.tanh(z)
    logp = -0.5 * noise ** 2 - log_std - 0.5 * LOG_2PI
    # Stable evaluation of log(1 - tanh(z)^2 + eps) (identical to torch's
    # log(1 - action.pow(2) + eps) in exact arithmetic).
    e2 = jnp.exp(-2.0 * jnp.abs(z))
    sech2 = 4.0 * e2 / ((1.0 + e2) ** 2)
    logp = logp - jnp.log(sech2 + EPSILON)
    return action, mean, log_std, jnp.sum(logp, axis=1, keepdims=True)


if __name__ == "__main__":
    # Small shapes consistent with an MLP policy; batch=30 exercises both the
    # batch-padding path and a 2-step ("parallel") batch grid.
    batch, input_size, hidden_sizes, output_size = 30, 16, (32, 32), 8

    key = jax.random.PRNGKey(0)
    k_params, k_state, k_noise = jax.random.split(key, 3)

    params = init_params(k_params, input_size, hidden_sizes, output_size)
    prep = prepare_params(params)  # one-time: fuse heads + cast weights
    state = jax.random.normal(k_state, (batch, input_size), jnp.float32)
    # reparameterization noise (Normal.rsample's standard-normal draw)
    noise = jax.random.normal(k_noise, (batch, output_size), jnp.float32)

    action, mean, log_std, log_prob = policy_forward(state, noise, prep)
    jax.block_until_ready((action, mean, log_std, log_prob))

    # sanity check against pure-JAX reference
    ra, rm, rs, rl = reference_forward(state, noise, params)
    np.testing.assert_allclose(np.asarray(action), np.asarray(ra), rtol=1e-3, atol=1e-3)
    np.testing.assert_allclose(np.asarray(mean), np.asarray(rm), rtol=1e-3, atol=1e-3)
    np.testing.assert_allclose(np.asarray(log_std), np.asarray(rs), rtol=1e-3, atol=1e-3)
    np.testing.assert_allclose(np.asarray(log_prob), np.asarray(rl), rtol=1e-3, atol=2e-3)

    print("KERNEL_OK")
</pallas_src>

<mosaic_0001>
module attributes {stable_mosaic.version = 11 : i64} {
  func.func @policy_kernel(%arg0: i32, %arg1: memref<16x16xf32, #tpu.memory_space<vmem>>, %arg2: memref<16x8xf32, #tpu.memory_space<vmem>>, %arg3: memref<16x32xf32, #tpu.memory_space<vmem>>, %arg4: memref<1x32xf32, #tpu.memory_space<vmem>>, %arg5: memref<32x32xf32, #tpu.memory_space<vmem>>, %arg6: memref<1x32xf32, #tpu.memory_space<vmem>>, %arg7: memref<32x16xf32, #tpu.memory_space<vmem>>, %arg8: memref<1x16xf32, #tpu.memory_space<vmem>>, %arg9: memref<16x32xf32, #tpu.memory_space<vmem>>) attributes {dimension_semantics = [#tpu.dimension_semantics<parallel>], iteration_bounds = array<i64: 2>, scalar_prefetch = 0 : i64, scratch_operands = 0 : i64, tpu.core_type = #tpu.core_type<tc>, window_params = [{transform_indices = @transform_0, window_bounds = array<i64: 16, 16>}, {transform_indices = @transform_1, window_bounds = array<i64: 16, 8>}, {pipeline_mode = #tpu.pipeline_mode<synchronous>, transform_indices = @transform_2, window_bounds = array<i64: 16, 32>}, {pipeline_mode = #tpu.pipeline_mode<synchronous>, transform_indices = @transform_3, window_bounds = array<i64: 1, 32>}, {pipeline_mode = #tpu.pipeline_mode<synchronous>, transform_indices = @transform_4, window_bounds = array<i64: 32, 32>}, {pipeline_mode = #tpu.pipeline_mode<synchronous>, transform_indices = @transform_5, window_bounds = array<i64: 1, 32>}, {pipeline_mode = #tpu.pipeline_mode<synchronous>, transform_indices = @transform_6, window_bounds = array<i64: 32, 16>}, {pipeline_mode = #tpu.pipeline_mode<synchronous>, transform_indices = @transform_7, window_bounds = array<i64: 1, 16>}, {transform_indices = @transform_8, window_bounds = array<i64: 16, 32>}]} {
    %c0 = arith.constant 0 : index
    %c0_0 = arith.constant 0 : index
    %0 = vector.load %arg4[%c0, %c0_0] : memref<1x32xf32, #tpu.memory_space<vmem>>, vector<1x32xf32>
    %c0_1 = arith.constant 0 : index
    %c0_2 = arith.constant 0 : index
    %1 = vector.load %arg6[%c0_1, %c0_2] : memref<1x32xf32, #tpu.memory_space<vmem>>, vector<1x32xf32>
    %c0_3 = arith.constant 0 : index
    %c0_4 = arith.constant 0 : index
    %2 = vector.load %arg8[%c0_3, %c0_4] : memref<1x16xf32, #tpu.memory_space<vmem>>, vector<1x16xf32>
    %c0_5 = arith.constant 0 : index
    %c0_6 = arith.constant 0 : index
    %3 = vector.load %arg1[%c0_5, %c0_6] : memref<16x16xf32, #tpu.memory_space<vmem>>, vector<16x16xf32>
    %c0_7 = arith.constant 0 : index
    %c0_8 = arith.constant 0 : index
    %4 = vector.load %arg3[%c0_7, %c0_8] : memref<16x32xf32, #tpu.memory_space<vmem>>, vector<16x32xf32>
    %cst = arith.constant dense<0.000000e+00> : vector<16x32xf32>
    %5 = tpu.matmul %3, %4, %cst {dimension_numbers = #tpu.dot_dimension_numbers<[1], [0], [0], [1], [0, 0, 1, 1], [], []>} : vector<16x16xf32>, vector<16x32xf32>, vector<16x32xf32> -> vector<16x32xf32>
    %6 = vector.broadcast %0 : vector<1x32xf32> to vector<16x32xf32>
    %7 = arith.addf %5, %6 : vector<16x32xf32>
    %cst_9 = arith.constant 0.000000e+00 : f32
    %8 = vector.broadcast %cst_9 : f32 to vector<16x32xf32>
    %9 = arith.maximumf %7, %8 : vector<16x32xf32>
    %c0_10 = arith.constant 0 : index
    %c0_11 = arith.constant 0 : index
    %10 = vector.load %arg5[%c0_10, %c0_11] : memref<32x32xf32, #tpu.memory_space<vmem>>, vector<32x32xf32>
    %cst_12 = arith.constant dense<0.000000e+00> : vector<16x32xf32>
    %11 = tpu.matmul %9, %10, %cst_12 {dimension_numbers = #tpu.dot_dimension_numbers<[1], [0], [0], [1], [0, 0, 1, 1], [], []>} : vector<16x32xf32>, vector<32x32xf32>, vector<16x32xf32> -> vector<16x32xf32>
    %12 = vector.broadcast %1 : vector<1x32xf32> to vector<16x32xf32>
    %13 = arith.addf %11, %12 : vector<16x32xf32>
    %cst_13 = arith.constant 0.000000e+00 : f32
    %14 = vector.broadcast %cst_13 : f32 to vector<16x32xf32>
    %15 = arith.maximumf %13, %14 : vector<16x32xf32>
    %c0_14 = arith.constant 0 : index
    %c0_15 = arith.constant 0 : index
    %16 = vector.load %arg7[%c0_14, %c0_15] : memref<32x16xf32, #tpu.memory_space<vmem>>, vector<32x16xf32>
    %cst_16 = arith.constant dense<0.000000e+00> : vector<16x16xf32>
    %17 = tpu.matmul %15, %16, %cst_16 {dimension_numbers = #tpu.dot_dimension_numbers<[1], [0], [0], [1], [0, 0, 1, 1], [], []>} : vector<16x32xf32>, vector<32x16xf32>, vector<16x16xf32> -> vector<16x16xf32>
    %18 = vector.broadcast %2 : vector<1x16xf32> to vector<16x16xf32>
    %19 = arith.addf %17, %18 : vector<16x16xf32>
    %20 = vector.extract_strided_slice %19 {offsets = [0, 0], sizes = [16, 8], strides = [1, 1]} : vector<16x16xf32> to vector<16x8xf32>
    %21 = vector.extract_strided_slice %19 {offsets = [0, 8], sizes = [16, 8], strides = [1, 1]} : vector<16x16xf32> to vector<16x8xf32>
    %cst_17 = arith.constant -2.000000e+01 : f32
    %cst_18 = arith.constant 2.000000e+00 : f32
    %22 = vector.broadcast %cst_17 : f32 to vector<16x8xf32>
    %23 = arith.maximumf %22, %21 : vector<16x8xf32>
    %24 = vector.broadcast %cst_18 : f32 to vector<16x8xf32>
    %25 = arith.minimumf %24, %23 : vector<16x8xf32>
    %26 = math.exp %25 : vector<16x8xf32>
    %c0_19 = arith.constant 0 : index
    %c0_20 = arith.constant 0 : index
    %27 = vector.load %arg2[%c0_19, %c0_20] : memref<16x8xf32, #tpu.memory_space<vmem>>, vector<16x8xf32>
    %28 = arith.mulf %26, %27 : vector<16x8xf32>
    %29 = arith.addf %20, %28 : vector<16x8xf32>
    %30 = math.absf %29 : vector<16x8xf32>
    %cst_21 = arith.constant -2.000000e+00 : f32
    %31 = vector.broadcast %cst_21 : f32 to vector<16x8xf32>
    %32 = arith.mulf %31, %30 : vector<16x8xf32>
    %33 = math.exp %32 : vector<16x8xf32>
    %cst_22 = arith.constant 1.000000e+00 : f32
    %34 = vector.broadcast %cst_22 : f32 to vector<16x8xf32>
    %35 = arith.addf %34, %33 : vector<16x8xf32>
    %cst_23 = arith.constant 1.000000e+00 : f32
    %36 = vector.broadcast %cst_23 : f32 to vector<16x8xf32>
    %37 = arith.divf %36, %35 : vector<16x8xf32>
    %cst_24 = arith.constant 1.000000e+00 : f32
    %38 = vector.broadcast %cst_24 : f32 to vector<16x8xf32>
    %39 = arith.subf %38, %33 : vector<16x8xf32>
    %40 = arith.mulf %39, %37 : vector<16x8xf32>
    %cst_25 = arith.constant 0.000000e+00 : f32
    %41 = vector.broadcast %cst_25 : f32 to vector<16x8xf32>
    %42 = arith.cmpf oge, %29, %41 : vector<16x8xf32>
    %cst_26 = arith.constant 0.000000e+00 : f32
    %43 = vector.broadcast %cst_26 : f32 to vector<16x8xf32>
    %44 = arith.subf %43, %40 : vector<16x8xf32>
    %45 = arith.select %42, %40, %44 : vector<16x8xi1>, vector<16x8xf32>
    %cst_27 = arith.constant 4.000000e+00 : f32
    %46 = vector.broadcast %cst_27 : f32 to vector<16x8xf32>
    %47 = arith.mulf %46, %33 : vector<16x8xf32>
    %48 = arith.mulf %47, %37 : vector<16x8xf32>
    %49 = arith.mulf %48, %37 : vector<16x8xf32>
    %cst_28 = arith.constant -5.000000e-01 : f32
    %50 = vector.broadcast %cst_28 : f32 to vector<16x8xf32>
    %51 = arith.mulf %50, %27 : vector<16x8xf32>
    %52 = arith.mulf %51, %27 : vector<16x8xf32>
    %53 = arith.subf %52, %25 : vector<16x8xf32>
    %cst_29 = arith.constant 0.918938517 : f32
    %54 = vector.broadcast %cst_29 : f32 to vector<16x8xf32>
    %55 = arith.subf %53, %54 : vector<16x8xf32>
    %cst_30 = arith.constant 9.99999997E-7 : f32
    %56 = vector.broadcast %cst_30 : f32 to vector<16x8xf32>
    %57 = arith.addf %49, %56 : vector<16x8xf32>
    %58 = math.log %57 : vector<16x8xf32>
    %59 = arith.subf %55, %58 : vector<16x8xf32>
    %cst_31 = arith.constant dense<0.000000e+00> : vector<16xf32>
    %60 = vector.multi_reduction <add>, %59, %cst_31 [1] : vector<16x8xf32> to vector<16xf32>
    %61 = vector.shape_cast %60 : vector<16xf32> to vector<16x1xf32>
    %62 = vector.shape_cast %61 : vector<16x1xf32> to vector<16x1xf32>
    %63 = vector.broadcast %62 : vector<16x1xf32> to vector<16x8xf32>
    %64 = tpu.concatenate %45, %20, %25, %63 in 1 : vector<16x8xf32>, vector<16x8xf32>, vector<16x8xf32>, vector<16x8xf32> -> vector<16x32xf32>
    %c0_32 = arith.constant 0 : index
    %c0_33 = arith.constant 0 : index
    %65 = vector.load %arg9[%c0_32, %c0_33] : memref<16x32xf32, #tpu.memory_space<vmem>>, vector<16x32xf32>
    tpu.vector_store %arg9[%c0_32, %c0_33], %64 {strides = array<i32>} : memref<16x32xf32, #tpu.memory_space<vmem>>, vector<16x32xf32>,
    return
  }
  func.func @transform_0(%arg0: i32) -> (i32, i32) {
    %c0_i32 = arith.constant 0 : i32
    %c0_i32_0 = arith.constant 0 : i32
    return %arg0, %c0_i32 : i32, i32
  }
  func.func @transform_1(%arg0: i32) -> (i32, i32) {
    %c0_i32 = arith.constant 0 : i32
    %c0_i32_0 = arith.constant 0 : i32
    return %arg0, %c0_i32 : i32, i32
  }
  func.func @transform_2(%arg0: i32) -> (i32, i32) {
    %c0_i32 = arith.constant 0 : i32
    %c0_i32_0 = arith.constant 0 : i32
    %c0_i32_1 = arith.constant 0 : i32
    return %c0_i32, %c0_i32_0 : i32, i32
  }
  func.func @transform_3(%arg0: i32) -> (i32, i32) {
    %c0_i32 = arith.constant 0 : i32
    %c0_i32_0 = arith.constant 0 : i32
    %c0_i32_1 = arith.constant 0 : i32
    return %c0_i32, %c0_i32_0 : i32, i32
  }
  func.func @transform_4(%arg0: i32) -> (i32, i32) {
    %c0_i32 = arith.constant 0 : i32
    %c0_i32_0 = arith.constant 0 : i32
    %c0_i32_1 = arith.constant 0 : i32
    return %c0_i32, %c0_i32_0 : i32, i32
  }
  func.func @transform_5(%arg0: i32) -> (i32, i32) {
    %c0_i32 = arith.constant 0 : i32
    %c0_i32_0 = arith.constant 0 : i32
    %c0_i32_1 = arith.constant 0 : i32
    return %c0_i32, %c0_i32_0 : i32, i32
  }
  func.func @transform_6(%arg0: i32) -> (i32, i32) {
    %c0_i32 = arith.constant 0 : i32
    %c0_i32_0 = arith.constant 0 : i32
    %c0_i32_1 = arith.constant 0 : i32
    return %c0_i32, %c0_i32_0 : i32, i32
  }
  func.func @transform_7(%arg0: i32) -> (i32, i32) {
    %c0_i32 = arith.constant 0 : i32
    %c0_i32_0 = arith.constant 0 : i32
    %c0_i32_1 = arith.constant 0 : i32
    return %c0_i32, %c0_i32_0 : i32, i32
  }
  func.func @transform_8(%arg0: i32) -> (i32, i32) {
    %c0_i32 = arith.constant 0 : i32
    %c0_i32_0 = arith.constant 0 : i32
    return %arg0, %c0_i32 : i32, i32
  }
}

</mosaic_0001>

<bundles_post_ra>
// kernel: tpu_custom_call.1
= control target key start
LH: loop header
LB: loop body
LE: loop exit
PB: predicated region body
PF: predicated region fallthrough
CT: control target
= control target key end

     0   :  { %13 = vsyncpa [#allocation3], 0  ;;  %s1046_s0 = inlined_call_operand.vmem [shape: f32[32,16], index: 0, kind: input, shape index: {}]   ;;  %s1047_s1 = inlined_call_operand.vmem [shape: f32[32,8], index: 1, kind: input, shape index: {}]   ;;  %s1048_s2 = inlined_call_operand.vmem [shape: f32[16,32], index: 2, kind: input, shape index: {}]   ;;  %s1049_s3 = inlined_call_operand.vmem [shape: f32[1,32], index: 3, kind: input, shape index: {}]   ;;  %s1050_s4 = inlined_call_operand.vmem [shape: f32[32,32], index: 4, kind: input, shape index: {}]   ;;  %s1051_s5 = inlined_call_operand.vmem [shape: f32[1,32], index: 5, kind: input, shape index: {}]   ;;  %s1052_s6 = inlined_call_operand.vmem [shape: f32[32,16], index: 6, kind: input, shape index: {}]   ;;  %s1053_s7 = inlined_call_operand.vmem [shape: f32[1,16], index: 7, kind: input, shape index: {}]   ;;  %s1054_s8 = inlined_call_operand.hbm [shape: f32[32,32], index: 8, kind: output, shape index: {}]  }
   0x1   :  { %15 = vsyncpa [#allocation3 + $0x1], 0  ;;  %s876_s27 = smov 0   ;;  %s878_s28 = smov 0  }
   0x2   :  { %s880_s29 = smov 0   ;;  %s882_s30 = smov 0  }
   0x3 LB: > { %s897_s9 = sadd.s32 4294967295, %s826_s30   ;;  %s676_s10 = sadd.s32 4294967294, %s826_s30   ;;  %s826_s30 = sphi %s882_s30, %s1060_s30   ;;  %s822_s29 = sphi %s880_s29, %s1059_s29   ;;  %s818_s28 = sphi %s878_s28, %s1058_s28   ;;  %s814_s27 = sphi %s876_s27, %s1057_s27  }
   0x4   : > { %s901_s11 = sadd.s32 1, %s826_s30   ;;  %s206_s12 = sadd.s32 1, %s822_s29 }
   0x5   : > { %s203_s13 = ssub.s32 %s826_s30, %s901_s11  ;;  %p216_p0 = scmp.ne.s32.totalorder %s822_s29, %s818_s28 }
   0x6   : > { %p204_p1 = scmp.eq.s32.totalorder %s203_s13, 0  ;;  %p217_p2 = scmp.eq.s32.totalorder %s897_s9, 1 }
   0x7   : > { %p222_p3 = scmp.ne.s32.totalorder %s818_s28, %s814_s27  ;;  %p223_p4 = scmp.eq.s32.totalorder %s676_s10, 1 }
   0x8   : > { %s912_s14 = scalar_select %p204_p1, %s822_s29, %s206_s12  }
   0x9   : > { %p914_p5 = por %p217_p2, %p216_p0  ;;  %p918_p6 = por %p223_p4, %p222_p3 }
   0xa   : > { %p679_p7 = scmp.ge.s32.totalorder %s826_s30, 1  ;;  %p277_p8 = scmp.lt.s32.totalorder %s826_s30, 3 }
   0xc   : > { %p278_p9 = pnand %p679_p7, %p277_p8 }
   0xd   : > { %s681_s21 = sshll.u32 (!%p278_p9), %s897_s9, 1  ;;  %s828_s25 = smov (!%p278_p9), 8  }
   0xe   : > { %281 = sbr.rel (%p278_p9) target bundleno = 734 (0x2de), region = 52  ;;  %p317_p10 = scmp.lt.s32.totalorder (!%p278_p9), %s681_s21, 3 }
   0xf   : > { %s829_s12 = smov (!%p278_p9), 120   ;;  %s313_s13 = sand.u32 (!%p278_p9), 1, %s818_s28  }
  0x10   : > { %s680_s17 = sshll.u32 (!%p278_p9), %s313_s13, 4  ;;  %s698_s19 = sshll.u32 (!%p278_p9), %s897_s9, 4 }
  0x11   : > { %s315_s18 = scalar_lea.vmem (!%p278_p9), [#allocation2], %s680_s17 }
  0x12   : > { %s599_s26 = sshll.u32 (!%p278_p9), %s315_s18, 4  ;;  %s600_s26 = int_to_ptr.vmem [resolvable:$true] %s599_s26 }
  0x13   : > { %v335_v0 = vld [vmem:[%s1048_s2 + $0x8] sm:$0xff]  ;;  %v334_v1 = vld [vmem:[%s1048_s2] sm:$0xff]  ;;  %v374_v2 = vld [vmem:[%s1050_s4 + $0x18] sm:$0xff]  ;;  %s1062_s21 = smov (!%p317_p10, %s681_s21), 3  ;;  %vm339_vm0 = vcmask 130048   ;;  %vm378_vm1 = vcmask 261120  }
  0x14   : > { %360 = vmatpush.msra.mxu0 %v335_v0  ;;  %397 = vmatpush.msra.mxu1 %v374_v2  ;;  %s682_s24 = sshll.u32 %s1062_s21, 3  ;;  %v373_v5 = vld [vmem:[%s1050_s4 + $0x10] sm:$0xff]  ;;  %v372_v6 = vld [vmem:[%s1050_s4 + $0x8] sm:$0xff]  ;;  %v371_v7 = vld [vmem:[%s1050_s4] sm:$0xff]  ;;  %vm556_vm6 = vcmask 64512   ;;  %vm581_vm13 = vcmask 195584  }
  0x15   : > { %699 = vmatpush.msra.mxu3 %v374_v2  ;;  %s320_s10 = scalar_lea.vmem %s1046_s0, %s682_s24  ;;  %v413_v8 = vld [vmem:[%s1052_s6 + $0x18] sm:$0xff]  ;;  %v745_v9 = vld [vmem:[%s1049_s3] ss:$0 sm:$0xff]  ;;  %v412_v16 = vld [vmem:[%s1052_s6 + $0x10] sm:$0xff]  ;;  %s326_s23 = scalar_lea.vmem %s1047_s1, %s682_s24 }
  0x16   : > { %361 = vmatpush.msra.mxu0 %v334_v1  ;;  %v332_v3 = vld [vmem:[%s320_s10] sm:$0xff]  ;;  %v333_v4 = vld [vmem:[%s320_s10 + $0x8] sm:$0xff]  ;;  %398 = vmatpush.msra.mxu1 %v373_v5  ;;  %s587_s21 = scalar_lea.sflag [#allocation3], %s313_s13 }
  0x17   : > { %685 = vmatmul.msk.f32.vlgmr.msra.gmra.mxu0 %vm339_vm0, %v332_v3  ;;  %700 = vmatpush.msra.mxu3 %v373_v5  ;;  %v411_v17 = vld [vmem:[%s1052_s6 + $0x8] sm:$0xff]  ;;  %v410_v18 = vld [vmem:[%s1052_s6] sm:$0xff] }
  0x18   : > { %399 = vmatpush.msra.mxu1 %v372_v6  ;;  %435 = vmatpush.msra.mxu2 %v413_v8  ;;  %v975_v19 = vld [vmem:[%s326_s23] sm:$0xff]  ;;  %v979_v20 = vld [vmem:[%s326_s23 + $0x8] sm:$0xff]  ;;  %s598_s23 = scalar_lea.hbm %s1054_s8, %s698_s19  ;;  %s784_s19 = scalar_lea.hbm %s1054_s8, 32 }
  0x19   : > { %701 = vmatpush.msra.mxu3 %v372_v6  ;;  %458 = vrot.lane.b32.xlu0 %v975_v19, %s828_s25  ;;  %v746_v21 = vld [vmem:[%s1051_s5] ss:$0 sm:$0xff]  ;;  %s601_s10 = sshll.u32 %s598_s23, 4  ;;  %s602_s10 = int_to_ptr.hbm [resolvable:$true] %s601_s10 }
  0x1a   : > { %400 = vmatpush.msra.mxu1 %v371_v7  ;;  %436 = vmatpush.msra.mxu2 %v412_v16  ;;  %v747_v28 = vld [vmem:[%s1053_s7] ss:$0 sm:$0xff]  ;;  %s778_s24 = sshra.s32 %s602_s10, 4  ;;  %s779_s24 = int_to_ptr.hbm [resolvable:$true] %s778_s24 }
  0x1b   : > { %702 = vmatpush.msra.mxu3 %v371_v7  ;;  %s780_s9 = scalar_lea.hbm %s779_s24, 16  ;;  %p785_p0 = scmp.lt.s32.totalorder %s779_s24, %s1054_s8 }
  0x1c   : > { %437 = vmatpush.msra.mxu2 %v411_v17  ;;  %p781_p11 = scmp.ne.s32.totalorder %s779_s24, %s780_s9  ;;  %p786_p1 = scmp.lt.s32.totalorder %s784_s19, %s780_s9 }
  0x1e   : > { %438 = vmatpush.msra.mxu2 %v410_v18  ;;  %p782_p12 = pnand %p781_p11, %p914_p5  ;;  %p787_p2 = por %p786_p1, %p785_p0 }
  0x1f   : > { %686 = vmatmul.msk.f32.gmra.mxu0 %vm339_vm0, %v333_v4 }
  0x20   : > { %p783_p13 = pneg %p782_p12 }
  0x21   : > { %460 = vrot.lane.b32.xlu0 %v979_v20, %s828_s25 }
  0x22   : > { %p788_p3 = pnand %p787_p2, %p783_p13 }
  0x8b   : > { %v459_v34 = vpop.permute.xlu0 %458 }
  0x93   : > { %v461_v42 = vpop.permute.xlu0 %460 }
  0x94   : > { %v363_v10 = vpop.f32.mrf.mxu0 }
  0x95   : > { %v364_v11 = vadd.f32 %v745_v9, %v363_v10 }
  0x97   : > { %v369_v12 = vmax.f32 %v364_v11, 0.0 }
  0x99   : > { %687 = vmatmul.msk.f32.vlgmr.msra.gmra.mxu1 %vm378_vm1, %v369_v12 }
  0x9c   : > { %v366_v13 = vpop.f32.mrf.mxu0 }
  0x9d   : > { %v367_v14 = vadd.f32 %v745_v9, %v366_v13  ;;  %v532_v9 = vmul.f32 -0.5, %v975_v19 }
  0x9f   : > { %v370_v15 = vmax.f32 %v367_v14, 0.0  ;;  %v534_v17 = vmul.f32 %v532_v9, %v975_v19 }
  0xa1   : > { %688 = vmatmul.msk.f32.vlgmr.msra.gmra.mxu3 %vm378_vm1, %v370_v15 }
 0x116   : > { %v402_v22 = vpop.f32.mrf.mxu1 }
 0x117   : > { %v403_v23 = vadd.f32 %v746_v21, %v402_v22 }
 0x119   : > { %v408_v24 = vmax.f32 %v403_v23, 0.0 }
 0x11b   : > { %689 = vmatmul.msk.f32.vlgmr.msra.gmra.mxu2 %vm378_vm1, %v408_v24 }
 0x124   : > { %v405_v25 = vpop.f32.mrf.mxu3 }
 0x125   : > { %v406_v26 = vadd.f32 %v746_v21, %v405_v25 }
 0x127   : > { %v409_v27 = vmax.f32 %v406_v26, 0.0 }
 0x129   : > { %690 = vmatmul.msk.f32.gmra.mxu2 %vm378_vm1, %v409_v27 }
 0x19e   : > { %v440_v29 = vpop.f32.mrf.mxu2 }
 0x19f   : > { %v441_v30 = vadd.f32 %v747_v28, %v440_v29 }
 0x1a1   : > { %565 = vrot.lane.b32.xlu0 %v441_v30, %s828_s25  ;;  %v446_v31 = vmax.f32 %v441_v30, -20.0 }
 0x1a3   : > { %v448_v32 = vmin.f32 %v446_v31, 2.0 }
 0x1a5   : > { %538 = vrot.lane.b32.xlu2 %v448_v32, %s829_s12  ;;  %v450_v33 = vmul.f32 1.442695, %v448_v32 }
 0x1a7   : > { %748 = vpow2.f32 %v450_v33 }
 0x1ac   : > { %v443_v35 = vpop.f32.mrf.mxu2 }
 0x1ad   : > { %v749_v36 = vpop.eup %748  ;;  %v444_v37 = vadd.f32 %v747_v28, %v443_v35 }
 0x1ae   : > { %v464_v38 = vmul.f32 %v749_v36, %v459_v34 }
 0x1af   : > { %v447_v39 = vmax.f32 %v444_v37, -20.0 }
 0x1b0   : > { %468 = vrot.lane.b32.xlu1 %v464_v38, %s829_s12 }
 0x1b1   : > { %v449_v40 = vmin.f32 %v447_v39, 2.0 }
 0x1b3   : > { %540 = vrot.lane.b32.xlu2 %v449_v40, %s829_s12  ;;  %v452_v41 = vmul.f32 1.442695, %v449_v40 }
 0x1b5   : > { %750 = vpow2.f32 %v452_v41 }
 0x1bb   : > { %v751_v43 = vpop.eup %750 }
 0x1bc   : > { %v465_v44 = vmul.f32 %v751_v43, %v461_v42 }
 0x1be   : > { %470 = vrot.lane.b32.xlu1 %v465_v44, %s829_s12 }
 0x1c6   : > { %567 = vrot.lane.b32.xlu1 %v444_v37, %s828_s25 }
 0x1ce   : > { %571 = vrot.lane.b32.xlu1 %v448_v32, %s828_s25 }
 0x1d6   : > { %573 = vrot.lane.b32.xlu1 %v449_v40, %s828_s25 }
 0x1ff   : > { %v539_v21 = vpop.permute.xlu2 %538 }
 0x200   : > { %v544_v26 = vsub.f32 %v534_v17, %v539_v21 }
 0x202   : > { %v691_v19 = vadd.f32 -0.9189385, %v544_v26 }
 0x213   : > { %v566_v13 = vpop.permute.xlu0 %565 }
 0x222   : > { %v469_v45 = vpop.permute.xlu1 %468 }
 0x223   : > { %v474_v46 = vadd.f32 %v469_v45, %v441_v30 }
 0x225   : > { %v476_v47 = vand.u32 2147483647, %v474_v46  ;;  %vm520_vm7 = vcmp.ge.f32.partialorder %v474_v46, 0.0 }
 0x227   : > { %v478_v48 = vmul.f32 -2.0, %v476_v47  ;;  %v541_v47 = vpop.permute.xlu2 %540 }
 0x229   : > { %v480_v49 = vmul.f32 1.442695, %v478_v48 }
 0x22b   : > { %752 = vpow2.f32 %v480_v49 }
 0x230   : > { %v471_v50 = vpop.permute.xlu1 %470 }
 0x231   : > { %v753_v51 = vpop.eup %752  ;;  %v995_v52 = vadd.f32 %v471_v50, %v444_v37  ;;  %v533_v37 = vmul.f32 -0.5, %v979_v20 }
 0x232   : > { %v484_v53 = vadd.f32 1.0, %v753_v51  ;;  %v516_v4 = vsub.f32 1.0, %v753_v51  ;;  %v526_v5 = vmul.f32 4.0, %v753_v51 }
 0x233   : > { %v477_v54 = vand.u32 2147483647, %v995_v52  ;;  %vm521_vm12 = vcmp.ge.f32.partialorder %v995_v52, 0.0  ;;  %v535_v45 = vmul.f32 %v533_v37, %v979_v20 }
 0x234   : > { %754 = vrcp.f32 %v484_v53  ;;  %v497_v60 = vand.u32 2147483648, %v484_v53  ;;  %v495_v63 = vand.u32 2147483647, %v484_v53  ;;  %vm491_vm3 = vweird.f32 %v484_v53 }
 0x235   : > { %v479_v55 = vmul.f32 -2.0, %v477_v54  ;;  %v545_v48 = vsub.f32 %v535_v45, %v541_v47 }
 0x236   : > { %v498_v2 = vor.u32 1.1754944e-38, %v497_v60  ;;  %vm496_vm5 = vcmp.eq.f32.partialorder %v495_v63, 8.507059e+37 }
 0x237   : > { %v482_v56 = vmul.f32 1.442695, %v479_v55  ;;  %v692_v50 = vadd.f32 -0.9189385, %v545_v48 }
 0x238   : > { %v568_v43 = vpop.permute.xlu1 %567 }
 0x239   : > { %756 = vpow2.f32 %v482_v56 }
 0x23a   : > { %v755_v57 = vpop.eup %754 }
 0x23b   : > { %v487_v58 = vmul.f32 %v755_v57, %v484_v53  ;;  %vm492_vm2 = vweird.f32 %v755_v57 }
 0x23c   : > { %vm493_vm4 = vmor %vm491_vm3, %vm492_vm2 }
 0x23d   : > { %v488_v59 = vsub.f32 1.0, %v487_v58 }
 0x23f   : > { %v757_v61 = vpop.eup %756  ;;  %v489_v62 = vmul.f32 %v755_v57, %v488_v59 }
 0x240   : > { %v485_v0 = vadd.f32 1.0, %v757_v61  ;;  %v517_v31 = vsub.f32 1.0, %v757_v61  ;;  %v527_v32 = vmul.f32 4.0, %v757_v61  ;;  %v572_v54 = vpop.permute.xlu1 %571 }
 0x241   : > { %v490_v1 = vadd.f32 %v755_v57, %v489_v62 }
 0x242   : > { %758 = vrcp.f32 %v485_v0  ;;  %v512_v23 = vand.u32 2147483648, %v485_v0  ;;  %v510_v25 = vand.u32 2147483647, %v485_v0  ;;  %vm506_vm9 = vweird.f32 %v485_v0 }
 0x243   : > { %v494_v3 = vsel %vm493_vm4, %v755_v57, %v490_v1 }
 0x244   : > { %v499_v6 = vsel %vm496_vm5, %v498_v2, %v494_v3  ;;  %v513_v28 = vor.u32 1.1754944e-38, %v512_v23  ;;  %vm511_vm11 = vcmp.eq.f32.partialorder %v510_v25, 8.507059e+37 }
 0x245   : > { %v518_v7 = vmul.f32 %v516_v4, %v499_v6  ;;  %v528_v8 = vmul.f32 %v526_v5, %v499_v6 }
 0x247   : > { %v522_v10 = vsub.f32 0.0, %v518_v7  ;;  %v530_v11 = vmul.f32 %v528_v8, %v499_v6 }
 0x248   : > { %v759_v12 = vpop.eup %758  ;;  %v574_v57 = vpop.permute.xlu1 %573 }
 0x249   : > { %v524_v14 = vsel %vm520_vm7, %v518_v7, %v522_v10  ;;  %v502_v15 = vmul.f32 %v759_v12, %v485_v0  ;;  %v548_v16 = vadd.f32 1e-06, %v530_v11  ;;  %vm507_vm8 = vweird.f32 %v759_v12 }
 0x24a   : > { %v577_v18 = vsel %vm556_vm6, %v524_v14, %v566_v13  ;;  %vm508_vm10 = vmor %vm506_vm9, %vm507_vm8 }
 0x24b   : > { %v503_v22 = vsub.f32 1.0, %v502_v15  ;;  %760 = vlog2.f32 %v548_v16  ;;  %v579_v55 = vsel %vm339_vm0, %v577_v18, %v572_v54 }
 0x24d   : > { %v504_v24 = vmul.f32 %v759_v12, %v503_v22 }
 0x24f   : > { %v505_v27 = vadd.f32 %v759_v12, %v504_v24 }
 0x251   : > { %v761_v29 = vpop.eup %760  ;;  %v509_v30 = vsel %vm508_vm10, %v759_v12, %v505_v27 }
 0x252   : > { %v514_v33 = vsel %vm511_vm11, %v513_v28, %v509_v30  ;;  %v551_v34 = vmul.f32 0.6931472, %v761_v29 }
 0x253   : > { %v519_v35 = vmul.f32 %v517_v31, %v514_v33  ;;  %v529_v36 = vmul.f32 %v527_v32, %v514_v33 }
 0x254   : > { %v554_v38 = vsub.f32 %v691_v19, %v551_v34 }
 0x255   : > { %v523_v39 = vsub.f32 0.0, %v519_v35  ;;  %v531_v40 = vmul.f32 %v529_v36, %v514_v33 }
 0x256   : > { %v557_v41 = vsel %vm556_vm6, %v554_v38, 0.0 }
 0x257   : > { %v525_v42 = vsel %vm521_vm12, %v519_v35, %v523_v39  ;;  %558 = vadd.xlane.f32.xlu2 %v557_v41  ;;  %v549_v44 = vadd.f32 1e-06, %v531_v40 }
 0x258   : > { %v578_v46 = vsel %vm556_vm6, %v525_v42, %v568_v43 }
 0x259   : > { %762 = vlog2.f32 %v549_v44  ;;  %v580_v58 = vsel %vm339_vm0, %v578_v46, %v574_v57 }
 0x25f   : > { %v763_v49 = vpop.eup %762 }
 0x260   : > { %v553_v51 = vmul.f32 0.6931472, %v763_v49 }
 0x262   : > { %v555_v53 = vsub.f32 %v692_v50, %v553_v51 }
 0x264   : > { %v560_v52 = vsel %vm556_vm6, %v555_v53, 0.0 }
 0x265   : > { %561 = vadd.xlane.f32.xlu0 %v560_v52 }
 0x2ca   : > { %v559_v20 = vpop.xlane.xlu2 %558 }
 0x2cb   : > { %v582_v56 = vsel %vm581_vm13, %v579_v55, %v559_v20 }
 0x2cc   : > { %584 = vst.msk [vmem:[%s315_s18] sm:$0xff] %vm378_vm1, %v582_v56 }
 0x2d8   : > { %v562_v59 = vpop.xlane.xlu0 %561 }
 0x2d9   : > { %v583_v60 = vsel %vm581_vm13, %v580_v58, %v562_v59 }
 0x2da   : > { %585 = vst.msk [vmem:[%s315_s18 + $0x8] sm:$0xff] %vm378_vm1, %v583_v60 }
 0x2db   : > { %791 = shalt.err (!%p788_p3)
}
 0x2dc   : > { %s830_s13 = smov 128  }
 0x2dd   : > { %703 = dma.vmem_to_hbm [thread:$0]  (%p914_p5), %s600_s26, 256, %s602_s10, %s587_s21, %s830_s13, %s830_s13, %s828_s25  }
 0x2de PF: > { %p709_p4 = scmp.ge.s32.totalorder %s826_s30, 2  ;;  %s616_s18 = sand.u32 1, %s814_s27  }
 0x2df   : > { %s617_s23 = scalar_lea.sflag [#allocation3], %s616_s18 }
 0x2e0   : > { %p706_p7 = pnand %p709_p4, %p918_p6 }
 0x2e2   : > { %p707_p8 = pneg %p706_p7 }
 0x2e4   : > { %809 = dma.done.wait (%p707_p8), %s617_s23, 256  }
 0x2e5   : > { %811 = vsyncadd (%p707_p8), %s617_s23, 4294967040  ;;  %p18_p9 = scmp.ge.s32.totalorder %s901_s11, 4   ;;  %s1057_s27 = smov %s818_s28 }
 0x2e6   : > { %s1058_s28 = smov %s822_s29  ;;  %s1059_s29 = smov %s912_s14 }
 0x2e7   : > { %s1060_s30 = smov %s901_s11  ;;  %20 = sbr.rel (!%p18_p9) target bundleno = 3 (0x3), region = 90 }
 0x2ec   :  { %623 = vsyncpa [#allocation3], 1 }
 0x2ed   :  { %625 = vsyncpa [#allocation3 + $0x1], 1 }

</bundles_post_ra>
